<compile_context>
chip_gen: v7x
topology: tpu7x:2x2x1
jax: 0.10.0
libtpu: 0.0.40
codegen_flags: <defaults>
</compile_context>

<pallas_src>
import math

import jax
import jax.numpy as jnp
from jax.experimental import pallas as pl
from jax.experimental.pallas import tpu as pltpu

LEAKY_ALPHA = 0.2   # nn.LeakyReLU(alpha)
EPS = 9e-15
NEG_LARGE = -3.0e38  # finite stand-in for "no edge seen yet" (avoids -inf - -inf NaN)


def _round_up(x, m):
    return (x + m - 1) // m * m


# ---------------------------------------------------------------------------
# Kernel A: node projection.  h = x @ W + bias (stored bf16 for the MXU
# aggregation), plus the fused attention projections sd = [h·a_src, h·a_dst].
# ---------------------------------------------------------------------------
def _project_kernel(x_ref, w_ref, b_ref, a_ref, h_ref, sd_ref):
    h = jnp.dot(x_ref[...].astype(jnp.float32), w_ref[...],
                preferred_element_type=jnp.float32) + b_ref[...]        # (TM, Fp)
    h_ref[...] = h.astype(h_ref.dtype)
    # one (TM,Fp)x(Fp,2) matmul instead of two (TM,Fp)x(Fp,1) matmuls
    sd_ref[...] = jnp.dot(h, a_ref[...], preferred_element_type=jnp.float32)


# ---------------------------------------------------------------------------
# Kernel B: global max of LeakyReLU(s_i + d_j) over existing edges only
# (matches torch.max(edge_e_a)).  Tiled scan over the int8 mask; scalar
# accumulator lives in the (1,1) output block, revisited every grid step.
# ---------------------------------------------------------------------------
def _edge_max_kernel(s_ref, d_ref, mask_ref, emax_ref):
    i = pl.program_id(0)
    j = pl.program_id(1)

    @pl.when((i == 0) & (j == 0))
    def _():
        emax_ref[...] = jnp.full_like(emax_ref, NEG_LARGE)

    e = s_ref[...] + d_ref[...]                          # (TM, TN)
    e = jnp.where(e > 0, e, LEAKY_ALPHA * e)             # LeakyReLU
    e = jnp.where(mask_ref[...] != 0, e, -jnp.inf)       # edges only
    emax_ref[...] = jnp.maximum(emax_ref[...], jnp.max(e))


# ---------------------------------------------------------------------------
# Kernel C: masked softmax numerators + neighbor aggregation.
# Grid = (row tiles, column tiles), reduction (column) axis last; h' and the
# row-sum accumulate in VMEM scratch and are finalized on the last column tile.
# ---------------------------------------------------------------------------
def _aggregate_kernel(emax_ref, s_ref, d_ref, mask_ref, h_ref, out_ref,
                      acc_ref, row_ref):
    j = pl.program_id(1)

    @pl.when(j == 0)
    def _():
        acc_ref[...] = jnp.zeros_like(acc_ref)
        row_ref[...] = jnp.zeros_like(row_ref)

    e = s_ref[...] + d_ref[...]                          # (TM, TN)
    e = jnp.where(e > 0, e, LEAKY_ALPHA * e)             # LeakyReLU
    e = jnp.where(mask_ref[...] != 0, e, -jnp.inf)       # mask BEFORE the exp
    edge_e = jnp.exp(e - emax_ref[...])                  # exp(-inf) == 0 on non-edges

    row_ref[...] += jnp.sum(edge_e, axis=1, keepdims=True)
    # bf16 x bf16 MXU matmul, f32 accumulation
    acc_ref[...] += jnp.dot(edge_e.astype(jnp.bfloat16), h_ref[...],
                            preferred_element_type=jnp.float32)

    @pl.when(j == pl.num_programs(1) - 1)
    def _():
        h_prime = acc_ref[...] / (row_ref[...] + EPS)
        # ELU (concat=True, eluF=True)
        out_ref[...] = jnp.where(h_prime > 0, h_prime,
                                 jnp.exp(h_prime) - 1.0).astype(out_ref.dtype)


# ---------------------------------------------------------------------------
# Wrapper: pad to lane-dense shapes, run projection -> edge-max -> aggregation.
# ---------------------------------------------------------------------------
def sp_graph_attention_layer(x, adj_mask, W, bias, a, *, tm=128, tn=128):
    """Forward pass of SpGraphAttentionLayer (mode='GAT', concat=True, eval)."""
    N, f_in = x.shape
    f_out = W.shape[1]

    node_mult = math.lcm(tm, tn)
    Np = _round_up(N, node_mult)          # node axis padded to tile multiples
    Fp = _round_up(f_out, 128)            # feature axis padded lane-dense

    # Padded parameters (zeros in padding keep padded features / nodes inert).
    x_p = jnp.pad(x.astype(jnp.float32), ((0, Np - N), (0, 0)))
    W_p = jnp.pad(W.astype(jnp.float32), ((0, 0), (0, Fp - f_out)))
    b_p = jnp.pad(bias.astype(jnp.float32), ((0, 0), (0, Fp - f_out)))
    a_src = jnp.pad(a[:, :f_out].astype(jnp.float32), ((0, 0), (0, Fp - f_out)))
    a_dst = jnp.pad(a[:, f_out:2 * f_out].astype(jnp.float32),
                    ((0, 0), (0, Fp - f_out)))
    a_cat = jnp.concatenate([a_src, a_dst], axis=0).T            # (Fp, 2)

    # int8 adjacency mask (padded nodes have no edges).
    mask_i8 = (adj_mask != 0).astype(jnp.int8)
    mask_p = jnp.pad(mask_i8, ((0, Np - N), (0, Np - N)))

    r = Np // tm
    c = Np // tn

    # ---- Kernel A: h (bf16) and fused [s, d] --------------------------------
    h_bf16, sd = pl.pallas_call(
        _project_kernel,
        out_shape=(jax.ShapeDtypeStruct((Np, Fp), jnp.bfloat16),
                   jax.ShapeDtypeStruct((Np, 2), jnp.float32)),
        grid=(r,),
        in_specs=[pl.BlockSpec((tm, f_in), lambda i: (i, 0)),
                  pl.BlockSpec((f_in, Fp), lambda i: (0, 0)),
                  pl.BlockSpec((1, Fp), lambda i: (0, 0)),
                  pl.BlockSpec((Fp, 2), lambda i: (0, 0))],
        out_specs=(pl.BlockSpec((tm, Fp), lambda i: (i, 0)),
                   pl.BlockSpec((tm, 2), lambda i: (i, 0))),
        compiler_params=pltpu.CompilerParams(dimension_semantics=("parallel",)),
    )(x_p, W_p, b_p, a_cat)

    s = sd[:, 0:1]                        # (Np, 1)
    d_row = sd[:, 1:2].T                  # (1, Np) — pre-transposed once

    # ---- Kernel B: global max over existing edges ---------------------------
    e_max = pl.pallas_call(
        _edge_max_kernel,
        out_shape=jax.ShapeDtypeStruct((1, 1), jnp.float32),
        grid=(r, c),
        in_specs=[pl.BlockSpec((tm, 1), lambda i, j: (i, 0)),
                  pl.BlockSpec((1, tn), lambda i, j: (0, j)),
                  pl.BlockSpec((tm, tn), lambda i, j: (i, j))],
        out_specs=pl.BlockSpec((1, 1), lambda i, j: (0, 0)),
        compiler_params=pltpu.CompilerParams(
            dimension_semantics=("arbitrary", "arbitrary")),
    )(s, d_row, mask_p)

    # ---- Kernel C: masked softmax + aggregation + ELU ------------------------
    out_p = pl.pallas_call(
        _aggregate_kernel,
        out_shape=jax.ShapeDtypeStruct((Np, Fp), jnp.float32),
        grid=(r, c),
        in_specs=[pl.BlockSpec((1, 1), lambda i, j: (0, 0)),
                  pl.BlockSpec((tm, 1), lambda i, j: (i, 0)),
                  pl.BlockSpec((1, tn), lambda i, j: (0, j)),
                  pl.BlockSpec((tm, tn), lambda i, j: (i, j)),
                  pl.BlockSpec((tn, Fp), lambda i, j: (j, 0))],
        out_specs=pl.BlockSpec((tm, Fp), lambda i, j: (i, 0)),
        scratch_shapes=[pltpu.VMEM((tm, Fp), jnp.float32),
                        pltpu.VMEM((tm, 1), jnp.float32)],
        compiler_params=pltpu.CompilerParams(
            dimension_semantics=("parallel", "arbitrary")),
    )(e_max, s, d_row, mask_p, h_bf16)

    return out_p[:N, :f_out]


def _xavier_normal(key, shape, gain=1.414):
    # torch.nn.init.xavier_normal_ for 2D: fan_in = shape[1], fan_out = shape[0]
    fan_out, fan_in = shape[0], shape[1]
    std = gain * math.sqrt(2.0 / (fan_in + fan_out))
    return std * jax.random.normal(key, shape, dtype=jnp.float32)


if __name__ == "__main__":
    # Small deterministic problem: N=64 nodes, in_features=16, out_features=32.
    N, F_IN, F_OUT = 64, 16, 32
    key = jax.random.PRNGKey(0)
    k_x, k_adj, k_w, k_a, k_b = jax.random.split(key, 5)

    x = jax.random.normal(k_x, (N, F_IN), dtype=jnp.float32)

    # Random sparse adjacency (density ~0.15) + self loops, stored as int8.
    adj_mask = jax.random.bernoulli(k_adj, p=0.15, shape=(N, N)).astype(jnp.int8)
    adj_mask = jnp.maximum(adj_mask, jnp.eye(N, dtype=jnp.int8))

    # Parameters (shapes from SpGraphAttentionLayer.__init__), xavier_normal gain=1.414.
    W = _xavier_normal(k_w, (F_IN, F_OUT))
    a = _xavier_normal(k_a, (1, 2 * F_OUT))
    bias = _xavier_normal(k_b, (1, F_OUT))

    out = sp_graph_attention_layer(x, adj_mask, W, bias, a)
    jax.block_until_ready(out)
    assert out.shape == (N, F_OUT) and out.dtype == jnp.float32
    assert bool(jnp.all(jnp.isfinite(out)))
    print("KERNEL_OK")
</pallas_src>

<mosaic_0001>
module attributes {stable_mosaic.version = 11 : i64} {
  func.func @_project_kernel(%arg0: i32, %arg1: memref<128x16xf32, #tpu.memory_space<vmem>>, %arg2: memref<16x128xf32, #tpu.memory_space<vmem>>, %arg3: memref<1x128xf32, #tpu.memory_space<vmem>>, %arg4: memref<128x2xf32, #tpu.memory_space<vmem>>, %arg5: memref<128x128xbf16, #tpu.memory_space<vmem>>, %arg6: memref<128x2xf32, #tpu.memory_space<vmem>>) attributes {dimension_semantics = [#tpu.dimension_semantics<parallel>], iteration_bounds = array<i64: 1>, scalar_prefetch = 0 : i64, scratch_operands = 0 : i64, tpu.core_type = #tpu.core_type<tc>, window_params = [{transform_indices = @transform_0, window_bounds = array<i64: 128, 16>}, {pipeline_mode = #tpu.pipeline_mode<synchronous>, transform_indices = @transform_1, window_bounds = array<i64: 16, 128>}, {pipeline_mode = #tpu.pipeline_mode<synchronous>, transform_indices = @transform_2, window_bounds = array<i64: 1, 128>}, {pipeline_mode = #tpu.pipeline_mode<synchronous>, transform_indices = @transform_3, window_bounds = array<i64: 128, 2>}, {transform_indices = @transform_4, window_bounds = array<i64: 128, 128>}, {transform_indices = @transform_5, window_bounds = array<i64: 128, 2>}]} {
    %c0 = arith.constant 0 : index
    %c0_0 = arith.constant 0 : index
    %0 = vector.load %arg1[%c0, %c0_0] : memref<128x16xf32, #tpu.memory_space<vmem>>, vector<128x16xf32>
    %c0_1 = arith.constant 0 : index
    %c0_2 = arith.constant 0 : index
    %1 = vector.load %arg2[%c0_1, %c0_2] : memref<16x128xf32, #tpu.memory_space<vmem>>, vector<16x128xf32>
    %cst = arith.constant dense<0.000000e+00> : vector<128x128xf32>
    %2 = tpu.matmul %0, %1, %cst {dimension_numbers = #tpu.dot_dimension_numbers<[1], [0], [0], [1], [0, 0, 1, 1], [], []>} : vector<128x16xf32>, vector<16x128xf32>, vector<128x128xf32> -> vector<128x128xf32>
    %c0_3 = arith.constant 0 : index
    %c0_4 = arith.constant 0 : index
    %3 = vector.load %arg3[%c0_3, %c0_4] : memref<1x128xf32, #tpu.memory_space<vmem>>, vector<1x128xf32>
    %4 = vector.broadcast %3 : vector<1x128xf32> to vector<128x128xf32>
    %5 = arith.addf %2, %4 : vector<128x128xf32>
    %6 = arith.truncf %5 : vector<128x128xf32> to vector<128x128xbf16>
    %c0_5 = arith.constant 0 : index
    %c0_6 = arith.constant 0 : index
    %7 = vector.load %arg5[%c0_5, %c0_6] : memref<128x128xbf16, #tpu.memory_space<vmem>>, vector<128x128xbf16>
    tpu.vector_store %arg5[%c0_5, %c0_6], %6 {strides = array<i32>} : memref<128x128xbf16, #tpu.memory_space<vmem>>, vector<128x128xbf16>,
    %c0_7 = arith.constant 0 : index
    %c0_8 = arith.constant 0 : index
    %8 = vector.load %arg4[%c0_7, %c0_8] : memref<128x2xf32, #tpu.memory_space<vmem>>, vector<128x2xf32>
    %cst_9 = arith.constant dense<0.000000e+00> : vector<128x2xf32>
    %9 = tpu.matmul %5, %8, %cst_9 {dimension_numbers = #tpu.dot_dimension_numbers<[1], [0], [0], [1], [0, 0, 1, 1], [], []>} : vector<128x128xf32>, vector<128x2xf32>, vector<128x2xf32> -> vector<128x2xf32>
    %c0_10 = arith.constant 0 : index
    %c0_11 = arith.constant 0 : index
    %10 = vector.load %arg6[%c0_10, %c0_11] : memref<128x2xf32, #tpu.memory_space<vmem>>, vector<128x2xf32>
    tpu.vector_store %arg6[%c0_10, %c0_11], %9 {strides = array<i32>} : memref<128x2xf32, #tpu.memory_space<vmem>>, vector<128x2xf32>,
    return
  }
  func.func @transform_0(%arg0: i32) -> (i32, i32) {
    %c0_i32 = arith.constant 0 : i32
    %c0_i32_0 = arith.constant 0 : i32
    return %arg0, %c0_i32 : i32, i32
  }
  func.func @transform_1(%arg0: i32) -> (i32, i32) {
    %c0_i32 = arith.constant 0 : i32
    %c0_i32_0 = arith.constant 0 : i32
    %c0_i32_1 = arith.constant 0 : i32
    return %c0_i32, %c0_i32_0 : i32, i32
  }
  func.func @transform_2(%arg0: i32) -> (i32, i32) {
    %c0_i32 = arith.constant 0 : i32
    %c0_i32_0 = arith.constant 0 : i32
    %c0_i32_1 = arith.constant 0 : i32
    return %c0_i32, %c0_i32_0 : i32, i32
  }
  func.func @transform_3(%arg0: i32) -> (i32, i32) {
    %c0_i32 = arith.constant 0 : i32
    %c0_i32_0 = arith.constant 0 : i32
    %c0_i32_1 = arith.constant 0 : i32
    return %c0_i32, %c0_i32_0 : i32, i32
  }
  func.func @transform_4(%arg0: i32) -> (i32, i32) {
    %c0_i32 = arith.constant 0 : i32
    %c0_i32_0 = arith.constant 0 : i32
    return %arg0, %c0_i32 : i32, i32
  }
  func.func @transform_5(%arg0: i32) -> (i32, i32) {
    %c0_i32 = arith.constant 0 : i32
    %c0_i32_0 = arith.constant 0 : i32
    return %arg0, %c0_i32 : i32, i32
  }
}

</mosaic_0001>

<bundles_post_ra>
// kernel: tpu_custom_call.1
= control target key start
LH: loop header
LB: loop body
LE: loop exit
PB: predicated region body
PF: predicated region fallthrough
CT: control target
= control target key end

     0   :  { %vm45_vm0 = vcmask 130048   ;;  %s1056_s0 = inlined_call_operand.vmem [shape: f32[128,16], index: 0, kind: input, shape index: {}]   ;;  %s1057_s1 = inlined_call_operand.vmem [shape: f32[16,128], index: 1, kind: input, shape index: {}]   ;;  %s1058_s2 = inlined_call_operand.vmem [shape: f32[1,128], index: 2, kind: input, shape index: {}]   ;;  %s1059_s3 = inlined_call_operand.vmem [shape: f32[128,2], index: 3, kind: input, shape index: {}]   ;;  %s1060_s4 = inlined_call_operand.hbm [shape: bf16[128,128], index: 4, kind: output, shape index: {0}]   ;;  %s1061_s5 = inlined_call_operand.vmem [shape: f32[128,2], index: 5, kind: output, shape index: {1}]  }
   0x1   :  { %v36_v0 = vld [vmem:[%s1057_s1] sm:$0xff]  ;;  %v37_v1 = vld [vmem:[%s1057_s1 + $0x8] sm:$0xff]  ;;  %v22_v5 = vld [vmem:[%s1056_s0 + $0x10] sm:$0xff] }
   0x2   :  { %v20_v2 = vld [vmem:[%s1056_s0] sm:$0xff]  ;;  %v747_v3 = vpack.c.bf16 %v37_v1, %v36_v0  ;;  %v21_v4 = vld [vmem:[%s1056_s0 + $0x8] sm:$0xff]  ;;  %v321_v8 = vld [vmem:[%s1059_s3 + $0x10] sm:$0xff] }
   0x3   :  { %667 = vmatprep.mubr.msk.f32.mxu0 %vm45_vm0, %v20_v2  ;;  %v319_v6 = vld [vmem:[%s1059_s3] sm:$0xff]  ;;  %v320_v7 = vld [vmem:[%s1059_s3 + $0x8] sm:$0xff]  ;;  %v322_v10 = vld [vmem:[%s1059_s3 + $0x18] sm:$0xff] }
   0x4   :  { %748 = vmatprep.subr.bf16.mxu0 %v747_v3  ;;  %v751_v9 = vpack.c.bf16 %v320_v7, %v319_v6  ;;  %v23_v11 = vld [vmem:[%s1056_s0 + $0x18] sm:$0xff]  ;;  %v755_v12 = vpack.c.bf16 %v322_v10, %v321_v8  ;;  %v323_v13 = vld [vmem:[%s1059_s3 + $0x20] sm:$0xff]  ;;  %v324_v14 = vld [vmem:[%s1059_s3 + $0x28] sm:$0xff] }
   0x5   :  { %750 = vmatpush3.bf16.msra.mxu0 %v747_v3  ;;  %v24_v15 = vld [vmem:[%s1056_s0 + $0x20] sm:$0xff] }
   0x6   :  { %752 = vmatprep.subr.bf16.mxu0 %v751_v9  ;;  %783 = vmatprep.subr.bf16.mxu1 %v751_v9 }
   0x7   :  { %791 = vmatpush3.bf16.msra.mxu1 %v751_v9 }
   0x8   :  { %668 = vmatmul.mubr.msk.f32.vlgmr.msra.gmra.mrb[0].mxu0 %vm45_vm0, %v21_v4 }
   0x9   :  { %670 = vmatprep.mubr.msk.f32.mxu0 %vm45_vm0, %v22_v5  ;;  %754 = vmatpush3.bf16.msra.mxu0 %v751_v9 }
   0xa   :  { %11 = vsyncpa [#allocation3], 0  ;;  %756 = vmatprep.subr.bf16.mxu0 %v755_v12  ;;  %v759_v16 = vpack.c.bf16 %v324_v14, %v323_v13  ;;  %v25_v17 = vld [vmem:[%s1056_s0 + $0x28] sm:$0xff]  ;;  %v325_v18 = vld [vmem:[%s1059_s3 + $0x30] sm:$0xff]  ;;  %784 = vmatprep.subr.bf16.mxu1 %v755_v12 }
   0xb   :  { %v326_v19 = vld [vmem:[%s1059_s3 + $0x38] sm:$0xff]  ;;  %v26_v20 = vld [vmem:[%s1056_s0 + $0x30] sm:$0xff]  ;;  %792 = vmatpush3.bf16.msra.mxu1 %v755_v12  ;;  %v327_v23 = vld [vmem:[%s1059_s3 + $0x40] sm:$0xff] }
   0xc   :  { %671 = vmatmul.mubr.msk.f32.gmra.mrb[2].mxu0 %vm45_vm0, %v23_v11  ;;  %v763_v21 = vpack.c.bf16 %v326_v19, %v325_v18  ;;  %v27_v22 = vld [vmem:[%s1056_s0 + $0x38] sm:$0xff]  ;;  %v328_v24 = vld [vmem:[%s1059_s3 + $0x48] sm:$0xff]  ;;  %785 = vmatprep.subr.bf16.mxu1 %v759_v16  ;;  %v28_v25 = vld [vmem:[%s1056_s0 + $0x40] sm:$0xff] }
   0xd   :  { %673 = vmatprep.mubr.msk.f32.mxu0 %vm45_vm0, %v24_v15  ;;  %758 = vmatpush3.bf16.msra.mxu0 %v755_v12  ;;  %v767_v26 = vpack.c.bf16 %v328_v24, %v327_v23  ;;  %v29_v27 = vld [vmem:[%s1056_s0 + $0x48] sm:$0xff]  ;;  %v329_v28 = vld [vmem:[%s1059_s3 + $0x50] sm:$0xff]  ;;  %v330_v29 = vld [vmem:[%s1059_s3 + $0x58] sm:$0xff] }
   0xe   :  { %760 = vmatprep.subr.bf16.mxu0 %v759_v16  ;;  %v30_v30 = vld [vmem:[%s1056_s0 + $0x50] sm:$0xff]  ;;  %v771_v31 = vpack.c.bf16 %v330_v29, %v329_v28  ;;  %v31_v32 = vld [vmem:[%s1056_s0 + $0x58] sm:$0xff]  ;;  %v331_v33 = vld [vmem:[%s1059_s3 + $0x60] sm:$0xff] }
   0xf   :  { %793 = vmatpush3.bf16.msra.mxu1 %v759_v16  ;;  %v332_v34 = vld [vmem:[%s1059_s3 + $0x68] sm:$0xff]  ;;  %v32_v35 = vld [vmem:[%s1056_s0 + $0x60] sm:$0xff]  ;;  %v34_v38 = vld [vmem:[%s1056_s0 + $0x70] sm:$0xff] }
  0x10   :  { %674 = vmatmul.mubr.msk.f32.gmra.mrb[4].mxu0 %vm45_vm0, %v25_v17  ;;  %786 = vmatprep.subr.bf16.mxu1 %v763_v21  ;;  %v775_v36 = vpack.c.bf16 %v332_v34, %v331_v33  ;;  %v33_v37 = vld [vmem:[%s1056_s0 + $0x68] sm:$0xff]  ;;  %v35_v39 = vld [vmem:[%s1056_s0 + $0x78] sm:$0xff]  ;;  %v333_v40 = vld [vmem:[%s1059_s3 + $0x70] sm:$0xff] }
  0x11   :  { %676 = vmatprep.mubr.msk.f32.mxu0 %vm45_vm0, %v26_v20  ;;  %762 = vmatpush3.bf16.msra.mxu0 %v759_v16  ;;  %v334_v41 = vld [vmem:[%s1059_s3 + $0x78] sm:$0xff]  ;;  %v517_v43 = vld [vmem:[%s1058_s2] ss:$0 sm:$0xff]  ;;  %s826_s2 = smov [#allocation2]  }
  0x12   :  { %764 = vmatprep.subr.bf16.mxu0 %v763_v21  ;;  %v779_v42 = vpack.c.bf16 %v334_v41, %v333_v40  ;;  %s502_s3 = sshll.u32 %s826_s2, 4  ;;  %s503_s3 = int_to_ptr.vmem [resolvable:$true] %s502_s3 }
  0x13   :  { %794 = vmatpush3.bf16.msra.mxu1 %v763_v21  ;;  %s802_s9 = scalar_lea.vmem %s503_s3, 1024  ;;  %p807_p1 = scmp.lt.s32.totalorder %s503_s3, %s503_s3 }
  0x14   :  { %677 = vmatmul.mubr.msk.f32.gmra.mrb[6].mxu0 %vm45_vm0, %v27_v22  ;;  %787 = vmatprep.subr.bf16.mxu1 %v767_v26  ;;  %p803_p0 = scmp.ne.s32.totalorder %s503_s3, %s802_s9  ;;  %p808_p2 = scmp.lt.s32.totalorder %s802_s9, %s802_s9 }
  0x15   :  { %679 = vmatprep.mubr.msk.f32.mxu0 %vm45_vm0, %v28_v25  ;;  %766 = vmatpush3.bf16.msra.mxu0 %v763_v21 }
  0x16   :  { %768 = vmatprep.subr.bf16.mxu0 %v767_v26  ;;  %p809_p3 = por %p808_p2, %p807_p1 }
  0x17   :  { %795 = vmatpush3.bf16.msra.mxu1 %v767_v26 }
  0x18   :  { %680 = vmatmul.mubr.msk.f32.gmra.mrb[8].mxu0 %vm45_vm0, %v29_v27  ;;  %788 = vmatprep.subr.bf16.mxu1 %v771_v31  ;;  %p810_p4 = pnand %p809_p3, %p803_p0 }
  0x19   :  { %682 = vmatprep.mubr.msk.f32.mxu0 %vm45_vm0, %v30_v30  ;;  %770 = vmatpush3.bf16.msra.mxu0 %v767_v26 }
  0x1a   :  { %772 = vmatprep.subr.bf16.mxu0 %v771_v31 }
  0x1b   :  { %796 = vmatpush3.bf16.msra.mxu1 %v771_v31 }
  0x1c   :  { %683 = vmatmul.mubr.msk.f32.gmra.mrb[10].mxu0 %vm45_vm0, %v31_v32  ;;  %789 = vmatprep.subr.bf16.mxu1 %v775_v36 }
  0x1d   :  { %685 = vmatprep.mubr.msk.f32.mxu0 %vm45_vm0, %v32_v35  ;;  %774 = vmatpush3.bf16.msra.mxu0 %v771_v31 }
  0x1e   :  { %776 = vmatprep.subr.bf16.mxu0 %v775_v36 }
  0x1f   :  { %797 = vmatpush3.bf16.msra.mxu1 %v775_v36 }
  0x20   :  { %686 = vmatmul.mubr.msk.f32.gmra.mrb[12].mxu0 %vm45_vm0, %v33_v37  ;;  %790 = vmatprep.subr.bf16.mxu1 %v779_v42 }
  0x21   :  { %688 = vmatprep.mubr.msk.f32.mxu0 %vm45_vm0, %v34_v38  ;;  %778 = vmatpush3.bf16.msra.mxu0 %v775_v36 }
  0x22   :  { %780 = vmatprep.subr.bf16.mxu0 %v779_v42 }
  0x23   :  { %798 = vmatpush3.bf16.msra.mxu1 %v779_v42 }
  0x24   :  { %689 = vmatmul.mubr.msk.f32.gmra.mrb[14].mxu0 %vm45_vm0, %v35_v39 }
  0x25   :  { %782 = vmatpush3.bf16.msra.mxu0 %v779_v42 }
  0xdb   :  { %v669_v44 = vpop.f32.mrb[0].mxu0 }
  0xdc   :  { %v166_v45 = vadd.f32 %v669_v44, %v517_v43  ;;  %v160_v46 = vpop.f32.mrb[1].mxu0 }
  0xdd   :  { %v161_v47 = vadd.f32 %v517_v43, %v160_v46 }
  0xdf   :  { %v569_v48 = vpack.c.bf16 %v166_v45, %v161_v47  ;;  %v672_v49 = vpop.f32.mrb[2].mxu0  ;;  %723 = vmatprep.mubr.f32.mxu0 %v161_v47 }
  0xe0   :  { %v176_v50 = vadd.f32 %v672_v49, %v517_v43  ;;  %v170_v51 = vpop.f32.mrb[3].mxu0  ;;  %724 = vmatmul.mubr.f32.vlgmr.msra.gmra.mrb[16].mxu0 %v166_v45 }
  0xe1   :  { %570 = vst [vmem:[#allocation2] sm:$0xff] %v569_v48   ;;  %v171_v52 = vadd.f32 %v517_v43, %v170_v51 }
  0xe3   :  { %v574_v53 = vpack.c.bf16 %v176_v50, %v171_v52  ;;  %v675_v54 = vpop.f32.mrb[4].mxu0  ;;  %726 = vmatprep.mubr.f32.mxu0 %v171_v52 }
  0xe4   :  { %v186_v55 = vadd.f32 %v675_v54, %v517_v43  ;;  %v180_v56 = vpop.f32.mrb[5].mxu0  ;;  %727 = vmatmul.mubr.f32.gmra.mrb[18].mxu0 %v176_v50 }
  0xe5   :  { %606 = vst [vmem:[#allocation2 + $0x8] sm:$0xff] %v574_v53   ;;  %v181_v57 = vadd.f32 %v517_v43, %v180_v56 }
  0xe7   :  { %v579_v58 = vpack.c.bf16 %v186_v55, %v181_v57  ;;  %v678_v59 = vpop.f32.mrb[6].mxu0  ;;  %729 = vmatprep.mubr.f32.mxu0 %v181_v57 }
  0xe8   :  { %v196_v60 = vadd.f32 %v678_v59, %v517_v43  ;;  %v190_v61 = vpop.f32.mrb[7].mxu0  ;;  %730 = vmatmul.mubr.f32.gmra.mrb[20].mxu0 %v186_v55 }
  0xe9   :  { %607 = vst [vmem:[#allocation2 + $0x10] sm:$0xff] %v579_v58   ;;  %v191_v62 = vadd.f32 %v517_v43, %v190_v61 }
  0xeb   :  { %v584_v63 = vpack.c.bf16 %v196_v60, %v191_v62  ;;  %v681_v0 = vpop.f32.mrb[8].mxu0  ;;  %732 = vmatprep.mubr.f32.mxu1 %v191_v62 }
  0xec   :  { %v206_v1 = vadd.f32 %v681_v0, %v517_v43  ;;  %v200_v2 = vpop.f32.mrb[9].mxu0  ;;  %733 = vmatmul.mubr.f32.vlgmr.msra.gmra.mrb[0].mxu1 %v196_v60 }
  0xed   :  { %608 = vst [vmem:[#allocation2 + $0x18] sm:$0xff] %v584_v63   ;;  %v201_v3 = vadd.f32 %v517_v43, %v200_v2 }
  0xef   :  { %v589_v4 = vpack.c.bf16 %v206_v1, %v201_v3  ;;  %v684_v5 = vpop.f32.mrb[10].mxu0  ;;  %735 = vmatprep.mubr.f32.mxu1 %v201_v3 }
  0xf0   :  { %v216_v6 = vadd.f32 %v684_v5, %v517_v43  ;;  %v210_v7 = vpop.f32.mrb[11].mxu0  ;;  %736 = vmatmul.mubr.f32.gmra.mrb[2].mxu1 %v206_v1 }
  0xf1   :  { %609 = vst [vmem:[#allocation2 + $0x20] sm:$0xff] %v589_v4   ;;  %v211_v8 = vadd.f32 %v517_v43, %v210_v7 }
  0xf3   :  { %v594_v9 = vpack.c.bf16 %v216_v6, %v211_v8  ;;  %v687_v10 = vpop.f32.mrb[12].mxu0  ;;  %738 = vmatprep.mubr.f32.mxu1 %v211_v8 }
  0xf4   :  { %v226_v11 = vadd.f32 %v687_v10, %v517_v43  ;;  %v220_v12 = vpop.f32.mrb[13].mxu0  ;;  %739 = vmatmul.mubr.f32.gmra.mrb[4].mxu1 %v216_v6 }
  0xf5   :  { %610 = vst [vmem:[#allocation2 + $0x28] sm:$0xff] %v594_v9   ;;  %v221_v13 = vadd.f32 %v517_v43, %v220_v12 }
  0xf7   :  { %v599_v14 = vpack.c.bf16 %v226_v11, %v221_v13  ;;  %v690_v15 = vpop.f32.mrb[14].mxu0  ;;  %741 = vmatprep.mubr.f32.mxu1 %v221_v13 }
  0xf8   :  { %v236_v16 = vadd.f32 %v690_v15, %v517_v43  ;;  %v230_v17 = vpop.f32.mrb[15].mxu0  ;;  %742 = vmatmul.mubr.f32.gmra.mrb[6].mxu1 %v226_v11 }
  0xf9   :  { %611 = vst [vmem:[#allocation2 + $0x30] sm:$0xff] %v599_v14   ;;  %v231_v18 = vadd.f32 %v517_v43, %v230_v17 }
  0xfb   :  { %v604_v19 = vpack.c.bf16 %v236_v16, %v231_v18  ;;  %744 = vmatprep.mubr.f32.mxu1 %v231_v18 }
  0xfc   :  { %745 = vmatmul.mubr.f32.gmra.mrb[8].mxu1 %v236_v16 }
  0xfd   :  { %612 = vst [vmem:[#allocation2 + $0x38] sm:$0xff] %v604_v19  }
  0xfe   :  { %813 = shalt.err (!%p810_p4)
}
  0xff   :  { %s814_s12 = scalar_lea.hbm %s1060_s4, 1024 }
 0x100   :  { %p815_p5 = scmp.ne.s32.totalorder %s1060_s4, %s814_s12  ;;  %p818_p6 = scmp.lt.u32.totalorder %s814_s12, %s1060_s4 }
 0x102   :  { %p820_p7 = pnand %p818_p6, %p815_p5 }
 0x104   :  { %823 = shalt.err (!%p820_p7)
}
 0x105   :  { %s827_s17 = smov 64   ;;  %s828_s18 = smov 4   ;;  %vm480_vm1 = vcmask 15360  }
 0x106   :  { %508 = dma.vmem_to_hbm [thread:$0]  %s503_s3, 1024, %s1060_s4, [#allocation3], %s827_s17, %s827_s17, %s828_s18  }
 0x1b3   :  { %v725_v20 = vpop.f32.mrb[16].mxu0 }
 0x1b4   :  { %482 = vst.msk [vmem:[%s1061_s5 + $0x8] sm:$0xff] %vm480_vm1, %v725_v20  ;;  %v401_v21 = vpop.f32.mrb[17].mxu0 }
 0x1b5   :  { %481 = vst.msk [vmem:[%s1061_s5] sm:$0xff] %vm480_vm1, %v401_v21 }
 0x1b7   :  { %v728_v22 = vpop.f32.mrb[18].mxu0 }
 0x1b8   :  { %484 = vst.msk [vmem:[%s1061_s5 + $0x18] sm:$0xff] %vm480_vm1, %v728_v22  ;;  %v411_v23 = vpop.f32.mrb[19].mxu0 }
 0x1b9   :  { %483 = vst.msk [vmem:[%s1061_s5 + $0x10] sm:$0xff] %vm480_vm1, %v411_v23 }
 0x1bb   :  { %v731_v24 = vpop.f32.mrb[20].mxu0 }
 0x1bc   :  { %486 = vst.msk [vmem:[%s1061_s5 + $0x28] sm:$0xff] %vm480_vm1, %v731_v24  ;;  %v421_v25 = vpop.f32.mrb[21].mxu0 }
 0x1bd   :  { %485 = vst.msk [vmem:[%s1061_s5 + $0x20] sm:$0xff] %vm480_vm1, %v421_v25 }
 0x1bf   :  { %v734_v26 = vpop.f32.mrb[0].mxu1 }
 0x1c0   :  { %488 = vst.msk [vmem:[%s1061_s5 + $0x38] sm:$0xff] %vm480_vm1, %v734_v26  ;;  %v431_v27 = vpop.f32.mrb[1].mxu1 }
 0x1c1   :  { %487 = vst.msk [vmem:[%s1061_s5 + $0x30] sm:$0xff] %vm480_vm1, %v431_v27 }
 0x1c3   :  { %v737_v28 = vpop.f32.mrb[2].mxu1 }
 0x1c4   :  { %490 = vst.msk [vmem:[%s1061_s5 + $0x48] sm:$0xff] %vm480_vm1, %v737_v28  ;;  %v441_v29 = vpop.f32.mrb[3].mxu1 }
 0x1c5   :  { %489 = vst.msk [vmem:[%s1061_s5 + $0x40] sm:$0xff] %vm480_vm1, %v441_v29 }
 0x1c7   :  { %v740_v30 = vpop.f32.mrb[4].mxu1 }
 0x1c8   :  { %492 = vst.msk [vmem:[%s1061_s5 + $0x58] sm:$0xff] %vm480_vm1, %v740_v30  ;;  %v451_v31 = vpop.f32.mrb[5].mxu1 }
 0x1c9   :  { %491 = vst.msk [vmem:[%s1061_s5 + $0x50] sm:$0xff] %vm480_vm1, %v451_v31 }
 0x1cb   :  { %v743_v32 = vpop.f32.mrb[6].mxu1 }
 0x1cc   :  { %494 = vst.msk [vmem:[%s1061_s5 + $0x68] sm:$0xff] %vm480_vm1, %v743_v32  ;;  %v461_v33 = vpop.f32.mrb[7].mxu1 }
 0x1cd   :  { %493 = vst.msk [vmem:[%s1061_s5 + $0x60] sm:$0xff] %vm480_vm1, %v461_v33 }
 0x1cf   :  { %v746_v34 = vpop.f32.mrb[8].mxu1 }
 0x1d0   :  { %496 = vst.msk [vmem:[%s1061_s5 + $0x78] sm:$0xff] %vm480_vm1, %v746_v34  ;;  %v471_v35 = vpop.f32.mrb[9].mxu1 }
 0x1d1   :  { %495 = vst.msk [vmem:[%s1061_s5 + $0x70] sm:$0xff] %vm480_vm1, %v471_v35 }
 0x1d2   :  { %824 = dma.done.wait [#allocation3], 1024  }
 0x1d3   :  { %825 = vsyncadd [#allocation3], 4294966272 }
 0x1d4   :  { %516 = vsyncpa [#allocation3], 1 }

</bundles_post_ra>
